<compile_context>
chip_gen: v7x
topology: tpu7x:2x2x1
jax: 0.10.0
libtpu: 0.0.40
codegen_flags: <defaults>
</compile_context>

<pallas_src>
import functools

import jax
import jax.numpy as jnp
from jax.experimental import pallas as pl
from jax.experimental.pallas import tpu as pltpu


def _round_up(x, m):
    return ((x + m - 1) // m) * m


def _sfnn_fused_kernel(n_layers, x_ref, *refs):
    """refs = (w0, b0, w1, b1, ..., o_ref).

    Weights are pre-packed 2D (layer 0: head-concat along N; deeper layers:
    block-diagonal), so every layer is a single 2D matmul on the MXU.
    """
    o_ref = refs[-1]
    h = x_ref[...]                                     # (TB, in0) f32
    for l in range(n_layers):
        w = refs[2 * l][...]                           # packed, compute dtype
        b = refs[2 * l + 1][...]                       # (1, width_out) f32
        h = jnp.dot(h.astype(w.dtype), w,
                    preferred_element_type=jnp.float32) + b
        if l < n_layers - 1:                           # hidden layers: tanh
            h = jnp.tanh(h)                            # final layer: none
    o_ref[...] = h.astype(o_ref.dtype)


def pack_sfnn_params(weights, biases, compute_dtype=jnp.bfloat16,
                     lane_multiple=128):
    """Pack per-head parameters ONCE (hoisted out of the per-call path).

    weights[l]: (K, in_l, out_l)   (torch Linear.weight transposed)
    biases[l]:  (K, 1, out_l)

    Returns (packed_w, packed_b, out_width) where out_width = K * out_last is
    the number of REAL output columns (the kernel output's last dim is padded
    to a multiple of `lane_multiple` for lane-dense stores).
    """
    n_layers = len(weights)
    K = weights[0].shape[0]
    out_width = K * weights[-1].shape[-1]
    out_pad = _round_up(out_width, lane_multiple)

    packed_w, packed_b = [], []
    for l in range(n_layers):
        w, b = weights[l], biases[l]
        _, in_l, out_l = w.shape
        if l == 0:
            # X shared by all heads: concat head weights along N, head-major.
            wp = jnp.transpose(w, (1, 0, 2)).reshape(in_l, K * out_l)
        else:
            # Heads independent: block-diagonal (K*in_l, K*out_l).
            wp = jnp.zeros((K * in_l, K * out_l), w.dtype)
            for k in range(K):                 # setup-time only (no eye-einsum)
                wp = wp.at[k * in_l:(k + 1) * in_l,
                           k * out_l:(k + 1) * out_l].set(w[k])
        bp = b.reshape(1, K * out_l).astype(jnp.float32)
        if l == n_layers - 1 and out_pad != K * out_l:
            # Pad final N to a lane multiple -> unmasked, lane-dense stores.
            wp = jnp.pad(wp, ((0, 0), (0, out_pad - K * out_l)))
            bp = jnp.pad(bp, ((0, 0), (0, out_pad - K * out_l)))
        packed_w.append(wp.astype(compute_dtype))
        packed_b.append(bp)                    # bias stays f32 (f32 accumulator)
    return packed_w, packed_b, out_width


def sfnn_forward(x, packed_w, packed_b, out_width, *, batch_tile=512):
    """x: (batch, in0) f32; packed_* from pack_sfnn_params.

    Returns (batch, out_width) == torch.cat([head_k(x) for k], dim=1).
    """
    n_layers = len(packed_w)
    batch, in0 = x.shape
    out_pad = packed_w[-1].shape[-1]
    assert batch_tile % 8 == 0
    # Either a multiple of 8 (tiled path) or the full batch dim (small batch);
    # both satisfy the (8,128) block constraint, no explicit pad copy needed.
    tb = batch if batch <= batch_tile else batch_tile
    grid = (pl.cdiv(batch, tb),)

    args = [x]
    for wp, bp in zip(packed_w, packed_b):
        args += [wp, bp]

    # ---- Cost estimate (lets XLA schedule surrounding ops correctly) ----
    nbytes = lambda a: a.size * a.dtype.itemsize
    flops, trans = 0, 0
    bytes_acc = nbytes(x) + batch * out_pad * x.dtype.itemsize
    for l, (wp, bp) in enumerate(zip(packed_w, packed_b)):
        flops += 2 * batch * wp.shape[0] * wp.shape[1]
        if l < n_layers - 1:
            trans += batch * wp.shape[1]           # tanh on hidden widths
        bytes_acc += nbytes(wp) + nbytes(bp)
    cost = pl.CostEstimate(flops=int(flops), transcendentals=int(trans),
                           bytes_accessed=int(bytes_acc))

    # ---- Explicit VMEM budget (fits v7x's 64 MiB; default scoped limit is
    #      32 MiB on v6e/v7x, 16 MiB on v5e) ----
    f32 = 4
    max_w = max(w.shape[1] for w in packed_w)
    weight_bytes = sum(nbytes(w) + nbytes(b)
                       for w, b in zip(packed_w, packed_b))
    tile_bytes = tb * in0 * f32 + tb * out_pad * f32       # per-buffer x + out
    vmem_limit = int(min(max(2 * tile_bytes + 2 * weight_bytes
                             + 4 * tb * max_w * f32 + (4 << 20),
                             16 << 20), 48 << 20))

    def run(weight_mode):
        wkw = {} if weight_mode is None else {"pipeline_mode": weight_mode}
        in_specs = [pl.BlockSpec((tb, in0), lambda i: (i, 0))]
        for wp, bp in zip(packed_w, packed_b):
            # Constant index_map -> DMA'd once, VMEM-resident across all tiles.
            in_specs.append(pl.BlockSpec(wp.shape, lambda i: (0, 0), **wkw))
            in_specs.append(pl.BlockSpec(bp.shape, lambda i: (0, 0), **wkw))
        return pl.pallas_call(
            functools.partial(_sfnn_fused_kernel, n_layers),
            out_shape=jax.ShapeDtypeStruct((batch, out_pad), x.dtype),
            grid=grid,
            in_specs=in_specs,
            out_specs=pl.BlockSpec((tb, out_pad), lambda i: (i, 0)),
            compiler_params=pltpu.CompilerParams(
                dimension_semantics=("parallel",),   # megacore split on v7x
                vmem_limit_bytes=vmem_limit),
            cost_estimate=cost,
        )(*args)

    try:
        # Single-buffer the resident weights (constant index_map => one buffer
        # suffices); halves their VMEM footprint, important on v7x (64 MiB).
        out = run(pl.Buffered(1))
    except Exception:
        # Fallback for jax versions without BlockSpec pipeline_mode/Buffered(1).
        out = run(None)

    # Drop the lane-padding columns; rows are already exact (no batch pad).
    return out[:, :out_width] if out_pad != out_width else out


if __name__ == "__main__":
    # Small shapes consistent with the module: SFNN(layer_sizes, n_output).
    layer_sizes = [16, 32, 32, 8]
    n_output = 2
    batch = 20          # batch_tile=8 below -> 3 batch tiles, last one partial

    key = jax.random.PRNGKey(0)
    keys = jax.random.split(key, len(layer_sizes))

    x = jax.random.normal(keys[0], (batch, layer_sizes[0]), dtype=jnp.float32)

    # Deterministic xavier-normal-scaled weights, zero biases, every layer.
    # (The module's default zero-init of the FINAL layer would make the output
    #  identically zero; non-trivial values exercise the kernel math.  Shapes
    #  match the module's parameters, stored transposed: (K, in, out).)
    weights, biases = [], []
    for l in range(len(layer_sizes) - 1):
        fan_in, fan_out = layer_sizes[l], layer_sizes[l + 1]
        std = (2.0 / (fan_in + fan_out)) ** 0.5
        w = std * jax.random.normal(
            keys[1 + l], (n_output, fan_in, fan_out), dtype=jnp.float32)
        b = jnp.zeros((n_output, 1, fan_out), dtype=jnp.float32)
        weights.append(w)
        biases.append(b)

    # Pack ONCE at model setup (hoisted out of the per-call path).
    packed_w, packed_b, out_width = pack_sfnn_params(
        weights, biases, compute_dtype=jnp.bfloat16)

    out = sfnn_forward(x, packed_w, packed_b, out_width, batch_tile=8)
    out = jax.block_until_ready(out)

    # Pure-JAX f32 reference mirroring the PyTorch forward exactly.
    ref_heads = []
    for k in range(n_output):
        h = x
        for l in range(len(weights)):
            h = h @ weights[l][k] + biases[l][k]
            if l < len(weights) - 1:
                h = jnp.tanh(h)
        ref_heads.append(h)
    ref = jnp.concatenate(ref_heads, axis=1)

    assert out.shape == (batch, n_output * layer_sizes[-1]), out.shape
    # bf16 weights on the MXU (f32 accumulation) => bf16-class accuracy vs the
    # f32 reference; tolerance sized accordingly (see precision note above).
    err = float(jnp.max(jnp.abs(out - ref)))
    assert jnp.allclose(out, ref, atol=2e-2, rtol=2e-2), err
    print("KERNEL_OK")
</pallas_src>

<mosaic_0001>
module attributes {stable_mosaic.version = 11 : i64} {
  func.func @_sfnn_fused_kernel(%arg0: i32, %arg1: memref<8x16xf32, #tpu.memory_space<vmem>>, %arg2: memref<16x64xbf16, #tpu.memory_space<vmem>>, %arg3: memref<1x64xf32, #tpu.memory_space<vmem>>, %arg4: memref<64x64xbf16, #tpu.memory_space<vmem>>, %arg5: memref<1x64xf32, #tpu.memory_space<vmem>>, %arg6: memref<64x128xbf16, #tpu.memory_space<vmem>>, %arg7: memref<1x128xf32, #tpu.memory_space<vmem>>, %arg8: memref<8x128xf32, #tpu.memory_space<vmem>>) attributes {dimension_semantics = [#tpu.dimension_semantics<parallel>], iteration_bounds = array<i64: 3>, scalar_prefetch = 0 : i64, scratch_operands = 0 : i64, tpu.core_type = #tpu.core_type<tc>, window_params = [{transform_indices = @transform_0, window_bounds = array<i64: 8, 16>}, {pipeline_mode = #tpu.pipeline_mode<synchronous>, transform_indices = @transform_1, window_bounds = array<i64: 16, 64>}, {pipeline_mode = #tpu.pipeline_mode<synchronous>, transform_indices = @transform_2, window_bounds = array<i64: 1, 64>}, {pipeline_mode = #tpu.pipeline_mode<synchronous>, transform_indices = @transform_3, window_bounds = array<i64: 64, 64>}, {pipeline_mode = #tpu.pipeline_mode<synchronous>, transform_indices = @transform_4, window_bounds = array<i64: 1, 64>}, {pipeline_mode = #tpu.pipeline_mode<synchronous>, transform_indices = @transform_5, window_bounds = array<i64: 64, 128>}, {pipeline_mode = #tpu.pipeline_mode<synchronous>, transform_indices = @transform_6, window_bounds = array<i64: 1, 128>}, {transform_indices = @transform_7, window_bounds = array<i64: 8, 128>}]} {
    %c0 = arith.constant 0 : index
    %c0_0 = arith.constant 0 : index
    %0 = vector.load %arg1[%c0, %c0_0] : memref<8x16xf32, #tpu.memory_space<vmem>>, vector<8x16xf32>
    %c0_1 = arith.constant 0 : index
    %c0_2 = arith.constant 0 : index
    %1 = vector.load %arg2[%c0_1, %c0_2] : memref<16x64xbf16, #tpu.memory_space<vmem>>, vector<16x64xbf16>
    %c0_3 = arith.constant 0 : index
    %c0_4 = arith.constant 0 : index
    %2 = vector.load %arg3[%c0_3, %c0_4] : memref<1x64xf32, #tpu.memory_space<vmem>>, vector<1x64xf32>
    %3 = arith.truncf %0 : vector<8x16xf32> to vector<8x16xbf16>
    %cst = arith.constant dense<0.000000e+00> : vector<8x64xf32>
    %4 = tpu.matmul %3, %1, %cst {dimension_numbers = #tpu.dot_dimension_numbers<[1], [0], [0], [1], [0, 0, 1, 1], [], []>} : vector<8x16xbf16>, vector<16x64xbf16>, vector<8x64xf32> -> vector<8x64xf32>
    %5 = vector.broadcast %2 : vector<1x64xf32> to vector<8x64xf32>
    %6 = arith.addf %4, %5 : vector<8x64xf32>
    %7 = math.tanh %6 : vector<8x64xf32>
    %c0_5 = arith.constant 0 : index
    %c0_6 = arith.constant 0 : index
    %8 = vector.load %arg4[%c0_5, %c0_6] : memref<64x64xbf16, #tpu.memory_space<vmem>>, vector<64x64xbf16>
    %c0_7 = arith.constant 0 : index
    %c0_8 = arith.constant 0 : index
    %9 = vector.load %arg5[%c0_7, %c0_8] : memref<1x64xf32, #tpu.memory_space<vmem>>, vector<1x64xf32>
    %10 = arith.truncf %7 : vector<8x64xf32> to vector<8x64xbf16>
    %cst_9 = arith.constant dense<0.000000e+00> : vector<8x64xf32>
    %11 = tpu.matmul %10, %8, %cst_9 {dimension_numbers = #tpu.dot_dimension_numbers<[1], [0], [0], [1], [0, 0, 1, 1], [], []>} : vector<8x64xbf16>, vector<64x64xbf16>, vector<8x64xf32> -> vector<8x64xf32>
    %12 = vector.broadcast %9 : vector<1x64xf32> to vector<8x64xf32>
    %13 = arith.addf %11, %12 : vector<8x64xf32>
    %14 = math.tanh %13 : vector<8x64xf32>
    %c0_10 = arith.constant 0 : index
    %c0_11 = arith.constant 0 : index
    %15 = vector.load %arg6[%c0_10, %c0_11] : memref<64x128xbf16, #tpu.memory_space<vmem>>, vector<64x128xbf16>
    %c0_12 = arith.constant 0 : index
    %c0_13 = arith.constant 0 : index
    %16 = vector.load %arg7[%c0_12, %c0_13] : memref<1x128xf32, #tpu.memory_space<vmem>>, vector<1x128xf32>
    %17 = arith.truncf %14 : vector<8x64xf32> to vector<8x64xbf16>
    %cst_14 = arith.constant dense<0.000000e+00> : vector<8x128xf32>
    %18 = tpu.matmul %17, %15, %cst_14 {dimension_numbers = #tpu.dot_dimension_numbers<[1], [0], [0], [1], [0, 0, 1, 1], [], []>} : vector<8x64xbf16>, vector<64x128xbf16>, vector<8x128xf32> -> vector<8x128xf32>
    %19 = vector.broadcast %16 : vector<1x128xf32> to vector<8x128xf32>
    %20 = arith.addf %18, %19 : vector<8x128xf32>
    %c0_15 = arith.constant 0 : index
    %c0_16 = arith.constant 0 : index
    %21 = vector.load %arg8[%c0_15, %c0_16] : memref<8x128xf32, #tpu.memory_space<vmem>>, vector<8x128xf32>
    tpu.vector_store %arg8[%c0_15, %c0_16], %20 {strides = array<i32>} : memref<8x128xf32, #tpu.memory_space<vmem>>, vector<8x128xf32>,
    return
  }
  func.func @transform_0(%arg0: i32) -> (i32, i32) {
    %c0_i32 = arith.constant 0 : i32
    %c0_i32_0 = arith.constant 0 : i32
    return %arg0, %c0_i32 : i32, i32
  }
  func.func @transform_1(%arg0: i32) -> (i32, i32) {
    %c0_i32 = arith.constant 0 : i32
    %c0_i32_0 = arith.constant 0 : i32
    %c0_i32_1 = arith.constant 0 : i32
    return %c0_i32, %c0_i32_0 : i32, i32
  }
  func.func @transform_2(%arg0: i32) -> (i32, i32) {
    %c0_i32 = arith.constant 0 : i32
    %c0_i32_0 = arith.constant 0 : i32
    %c0_i32_1 = arith.constant 0 : i32
    return %c0_i32, %c0_i32_0 : i32, i32
  }
  func.func @transform_3(%arg0: i32) -> (i32, i32) {
    %c0_i32 = arith.constant 0 : i32
    %c0_i32_0 = arith.constant 0 : i32
    %c0_i32_1 = arith.constant 0 : i32
    return %c0_i32, %c0_i32_0 : i32, i32
  }
  func.func @transform_4(%arg0: i32) -> (i32, i32) {
    %c0_i32 = arith.constant 0 : i32
    %c0_i32_0 = arith.constant 0 : i32
    %c0_i32_1 = arith.constant 0 : i32
    return %c0_i32, %c0_i32_0 : i32, i32
  }
  func.func @transform_5(%arg0: i32) -> (i32, i32) {
    %c0_i32 = arith.constant 0 : i32
    %c0_i32_0 = arith.constant 0 : i32
    %c0_i32_1 = arith.constant 0 : i32
    return %c0_i32, %c0_i32_0 : i32, i32
  }
  func.func @transform_6(%arg0: i32) -> (i32, i32) {
    %c0_i32 = arith.constant 0 : i32
    %c0_i32_0 = arith.constant 0 : i32
    %c0_i32_1 = arith.constant 0 : i32
    return %c0_i32, %c0_i32_0 : i32, i32
  }
  func.func @transform_7(%arg0: i32) -> (i32, i32) {
    %c0_i32 = arith.constant 0 : i32
    %c0_i32_0 = arith.constant 0 : i32
    return %arg0, %c0_i32 : i32, i32
  }
}

module attributes {stable_mosaic.version = 11 : i64} {
  func.func @_sfnn_fused_kernel(%arg0: i32, %arg1: memref<8x16xf32, #tpu.memory_space<vmem>>, %arg2: memref<16x64xbf16, #tpu.memory_space<vmem>>, %arg3: memref<1x64xf32, #tpu.memory_space<vmem>>, %arg4: memref<64x64xbf16, #tpu.memory_space<vmem>>, %arg5: memref<1x64xf32, #tpu.memory_space<vmem>>, %arg6: memref<64x128xbf16, #tpu.memory_space<vmem>>, %arg7: memref<1x128xf32, #tpu.memory_space<vmem>>, %arg8: memref<8x128xf32, #tpu.memory_space<vmem>>) attributes {dimension_semantics = [#tpu.dimension_semantics<parallel>], iteration_bounds = array<i64: 3>, scalar_prefetch = 0 : i64, scratch_operands = 0 : i64, tpu.core_type = #tpu.core_type<tc>, window_params = [{transform_indices = @transform_0, window_bounds = array<i64: 8, 16>}, {pipeline_mode = #tpu.pipeline_mode<synchronous>, transform_indices = @transform_1, window_bounds = array<i64: 16, 64>}, {pipeline_mode = #tpu.pipeline_mode<synchronous>, transform_indices = @transform_2, window_bounds = array<i64: 1, 64>}, {pipeline_mode = #tpu.pipeline_mode<synchronous>, transform_indices = @transform_3, window_bounds = array<i64: 64, 64>}, {pipeline_mode = #tpu.pipeline_mode<synchronous>, transform_indices = @transform_4, window_bounds = array<i64: 1, 64>}, {pipeline_mode = #tpu.pipeline_mode<synchronous>, transform_indices = @transform_5, window_bounds = array<i64: 64, 128>}, {pipeline_mode = #tpu.pipeline_mode<synchronous>, transform_indices = @transform_6, window_bounds = array<i64: 1, 128>}, {transform_indices = @transform_7, window_bounds = array<i64: 8, 128>}]} {
    %c0 = arith.constant 0 : index
    %c0_0 = arith.constant 0 : index
    %0 = vector.load %arg1[%c0, %c0_0] : memref<8x16xf32, #tpu.memory_space<vmem>>, vector<8x16xf32>
    %c0_1 = arith.constant 0 : index
    %c0_2 = arith.constant 0 : index
    %1 = vector.load %arg2[%c0_1, %c0_2] : memref<16x64xbf16, #tpu.memory_space<vmem>>, vector<16x64xbf16>
    %c0_3 = arith.constant 0 : index
    %c0_4 = arith.constant 0 : index
    %2 = vector.load %arg3[%c0_3, %c0_4] : memref<1x64xf32, #tpu.memory_space<vmem>>, vector<1x64xf32>
    %3 = arith.truncf %0 : vector<8x16xf32> to vector<8x16xbf16>
    %cst = arith.constant dense<0.000000e+00> : vector<8x64xf32>
    %4 = tpu.matmul %3, %1, %cst {dimension_numbers = #tpu.dot_dimension_numbers<[1], [0], [0], [1], [0, 0, 1, 1], [], []>} : vector<8x16xbf16>, vector<16x64xbf16>, vector<8x64xf32> -> vector<8x64xf32>
    %5 = vector.broadcast %2 : vector<1x64xf32> to vector<8x64xf32>
    %6 = arith.addf %4, %5 : vector<8x64xf32>
    %7 = math.tanh %6 : vector<8x64xf32>
    %c0_5 = arith.constant 0 : index
    %c0_6 = arith.constant 0 : index
    %8 = vector.load %arg4[%c0_5, %c0_6] : memref<64x64xbf16, #tpu.memory_space<vmem>>, vector<64x64xbf16>
    %c0_7 = arith.constant 0 : index
    %c0_8 = arith.constant 0 : index
    %9 = vector.load %arg5[%c0_7, %c0_8] : memref<1x64xf32, #tpu.memory_space<vmem>>, vector<1x64xf32>
    %10 = arith.truncf %7 : vector<8x64xf32> to vector<8x64xbf16>
    %cst_9 = arith.constant dense<0.000000e+00> : vector<8x64xf32>
    %11 = tpu.matmul %10, %8, %cst_9 {dimension_numbers = #tpu.dot_dimension_numbers<[1], [0], [0], [1], [0, 0, 1, 1], [], []>} : vector<8x64xbf16>, vector<64x64xbf16>, vector<8x64xf32> -> vector<8x64xf32>
    %12 = vector.broadcast %9 : vector<1x64xf32> to vector<8x64xf32>
    %13 = arith.addf %11, %12 : vector<8x64xf32>
    %14 = math.tanh %13 : vector<8x64xf32>
    %c0_10 = arith.constant 0 : index
    %c0_11 = arith.constant 0 : index
    %15 = vector.load %arg6[%c0_10, %c0_11] : memref<64x128xbf16, #tpu.memory_space<vmem>>, vector<64x128xbf16>
    %c0_12 = arith.constant 0 : index
    %c0_13 = arith.constant 0 : index
    %16 = vector.load %arg7[%c0_12, %c0_13] : memref<1x128xf32, #tpu.memory_space<vmem>>, vector<1x128xf32>
    %17 = arith.truncf %14 : vector<8x64xf32> to vector<8x64xbf16>
    %cst_14 = arith.constant dense<0.000000e+00> : vector<8x128xf32>
    %18 = tpu.matmul %17, %15, %cst_14 {dimension_numbers = #tpu.dot_dimension_numbers<[1], [0], [0], [1], [0, 0, 1, 1], [], []>} : vector<8x64xbf16>, vector<64x128xbf16>, vector<8x128xf32> -> vector<8x128xf32>
    %19 = vector.broadcast %16 : vector<1x128xf32> to vector<8x128xf32>
    %20 = arith.addf %18, %19 : vector<8x128xf32>
    %c0_15 = arith.constant 0 : index
    %c0_16 = arith.constant 0 : index
    %21 = vector.load %arg8[%c0_15, %c0_16] : memref<8x128xf32, #tpu.memory_space<vmem>>, vector<8x128xf32>
    tpu.vector_store %arg8[%c0_15, %c0_16], %20 {strides = array<i32>} : memref<8x128xf32, #tpu.memory_space<vmem>>, vector<8x128xf32>,
    return
  }
  func.func @transform_0(%arg0: i32) -> (i32, i32) {
    %c0_i32 = arith.constant 0 : i32
    %c0_i32_0 = arith.constant 0 : i32
    return %arg0, %c0_i32 : i32, i32
  }
  func.func @transform_1(%arg0: i32) -> (i32, i32) {
    %c0_i32 = arith.constant 0 : i32
    %c0_i32_0 = arith.constant 0 : i32
    %c0_i32_1 = arith.constant 0 : i32
    return %c0_i32, %c0_i32_0 : i32, i32
  }
  func.func @transform_2(%arg0: i32) -> (i32, i32) {
    %c0_i32 = arith.constant 0 : i32
    %c0_i32_0 = arith.constant 0 : i32
    %c0_i32_1 = arith.constant 0 : i32
    return %c0_i32, %c0_i32_0 : i32, i32
  }
  func.func @transform_3(%arg0: i32) -> (i32, i32) {
    %c0_i32 = arith.constant 0 : i32
    %c0_i32_0 = arith.constant 0 : i32
    %c0_i32_1 = arith.constant 0 : i32
    return %c0_i32, %c0_i32_0 : i32, i32
  }
  func.func @transform_4(%arg0: i32) -> (i32, i32) {
    %c0_i32 = arith.constant 0 : i32
    %c0_i32_0 = arith.constant 0 : i32
    %c0_i32_1 = arith.constant 0 : i32
    return %c0_i32, %c0_i32_0 : i32, i32
  }
  func.func @transform_5(%arg0: i32) -> (i32, i32) {
    %c0_i32 = arith.constant 0 : i32
    %c0_i32_0 = arith.constant 0 : i32
    %c0_i32_1 = arith.constant 0 : i32
    return %c0_i32, %c0_i32_0 : i32, i32
  }
  func.func @transform_6(%arg0: i32) -> (i32, i32) {
    %c0_i32 = arith.constant 0 : i32
    %c0_i32_0 = arith.constant 0 : i32
    %c0_i32_1 = arith.constant 0 : i32
    return %c0_i32, %c0_i32_0 : i32, i32
  }
  func.func @transform_7(%arg0: i32) -> (i32, i32) {
    %c0_i32 = arith.constant 0 : i32
    %c0_i32_0 = arith.constant 0 : i32
    return %arg0, %c0_i32 : i32, i32
  }
}

</mosaic_0001>

<bundles_post_ra>
// kernel: tpu_custom_call.1
= control target key start
LH: loop header
LB: loop body
LE: loop exit
PB: predicated region body
PF: predicated region fallthrough
CT: control target
= control target key end

     0   :  { %12 = vsyncpa [#allocation3], 0  ;;  %s1045_s0 = inlined_call_operand.vmem [shape: f32[20,16], index: 0, kind: input, shape index: {}]   ;;  %s1046_s1 = inlined_call_operand.vmem [shape: bf16[16,64], index: 1, kind: input, shape index: {}]   ;;  %s1047_s2 = inlined_call_operand.vmem [shape: f32[1,64], index: 2, kind: input, shape index: {}]   ;;  %s1048_s3 = inlined_call_operand.vmem [shape: bf16[64,64], index: 3, kind: input, shape index: {}]   ;;  %s1049_s4 = inlined_call_operand.vmem [shape: f32[1,64], index: 4, kind: input, shape index: {}]   ;;  %s1050_s5 = inlined_call_operand.hbm [shape: bf16[64,128], index: 5, kind: input, shape index: {}]   ;;  %s1051_s6 = inlined_call_operand.vmem [shape: f32[1,128], index: 6, kind: input, shape index: {}]   ;;  %s1052_s7 = inlined_call_operand.hbm [shape: f32[20,128], index: 7, kind: output, shape index: {}]  }
   0x1   :  { %13 = vsyncpa [#allocation4], 0 }
   0x2   :  { %15 = vsyncpa [#allocation4 + $0x1], 0  ;;  %s884_s24 = smov 0   ;;  %s886_s25 = smov 0  }
   0x3   :  { %s888_s26 = smov 0   ;;  %s890_s27 = smov 0  }
   0x4 LB: > { %s905_s28 = sadd.s32 4294967295, %s836_s27   ;;  %s606_s29 = sadd.s32 4294967294, %s836_s27   ;;  %s836_s27 = sphi %s890_s27, %s1068_s27   ;;  %s832_s26 = sphi %s888_s26, %s1067_s26   ;;  %s828_s25 = sphi %s886_s25, %s1066_s25   ;;  %s824_s24 = sphi %s884_s24, %s1065_s24  }
   0x5   : > { %s909_s30 = sadd.s32 1, %s836_s27   ;;  %s180_s8 = sadd.s32 1, %s832_s26 }
   0x6   : > { %s177_s9 = ssub.s32 %s836_s27, %s909_s30  ;;  %p190_p0 = scmp.ne.s32.totalorder %s832_s26, %s828_s25 }
   0x7   : > { %p178_p1 = scmp.eq.s32.totalorder %s177_s9, 0  ;;  %p191_p2 = scmp.eq.s32.totalorder %s905_s28, 2 }
   0x8   : > { %p196_p3 = scmp.ne.s32.totalorder %s828_s25, %s824_s24  ;;  %p197_p4 = scmp.eq.s32.totalorder %s606_s29, 2 }
   0x9   : > { %s920_s10 = scalar_select %p178_p1, %s832_s26, %s180_s8  }
   0xa   : > { %p922_p5 = por %p191_p2, %p190_p0  ;;  %p926_p6 = por %p197_p4, %p196_p3 }
   0xb   : > { %p607_p7 = scmp.ge.s32.totalorder %s836_s27, 1  ;;  %p204_p8 = scmp.lt.s32.totalorder %s836_s27, 4 }
   0xc   : > { %s1056_s11 = scalar_select %p922_p5, 1, 0 }
   0xd   : > { %s1057_s12 = scalar_select %p926_p6, 1, 0 }
   0xe   : > { %p1053_p9 = scmp.eq.s32.totalorder %s905_s28, 0  ;;  %p933_p10 = pnand %p607_p7, %p204_p8 }
   0xf   : > { %s838_s14 = smov [#allocation2]   ;;  %s742_s19 = scalar_lea.hbm %s1050_s5, 512 }
  0x10   : > { %s1058_s13 = scalar_select %p933_p10, 1, 0 }
  0x11   : > { %s228_s15 = sshll.u32 %s838_s14, 4  ;;  %p681_p11 = pneg %p933_p10  ;;  %s229_s15 = int_to_ptr.vmem [resolvable:$true] %s228_s15 }
  0x12   : > { %p743_p13 = scmp.ne.s32.totalorder %s1050_s5, %s742_s19  ;;  %p749_p3 = scmp.lt.u32.totalorder %s742_s19, %s1050_s5 }
  0x13   : > { %p941_p12 = pnand %p1053_p9, %p681_p11 }
  0x15   : > { %p744_p0 = pneg %p941_p12 }
  0x17   : > { %p745_p1 = pnand %p744_p0, %p743_p13 }
  0x19   : > { %p746_p2 = pneg %p745_p1 }
  0x1b   : > { %p751_p4 = pnand %p749_p3, %p746_p2 }
  0x1d   : > { %754 = shalt.err (!%p751_p4)
}
  0x1e   : > { %s755_s29 = scalar_lea.vmem %s229_s15, 512  ;;  %p763_p9 = scmp.lt.s32.totalorder %s229_s15, %s229_s15 }
  0x1f   : > { %p756_p7 = scmp.ne.s32.totalorder %s229_s15, %s755_s29  ;;  %p764_p6 = scmp.lt.s32.totalorder %s755_s29, %s755_s29 }
  0x21   : > { %p758_p8 = pnand %p756_p7, %p744_p0  ;;  %p765_p5 = por %p764_p6, %p763_p9 }
  0x23   : > { %p759_p11 = pneg %p758_p8 }
  0x25   : > { %p766_p10 = pnand %p765_p5, %p759_p11 }
  0x27   : > { %769 = shalt.err (!%p766_p10)
}
  0x28   : > { %s839_s8 = smov 64   ;;  %s840_s9 = smov 4  }
  0x29   : > { %684 = dma.hbm_to_vmem [thread:$0]  (!%p941_p12), %s1050_s5, 512, %s229_s15, [#allocation3], %s839_s8, %s839_s8, %s840_s9  }
  0x2a   : > { %p1060_p13 = scmp.ne.s32.totalorder %s1058_s13, 0 }
  0x2b   : > { %p1061_p1 = scmp.eq.s32.totalorder (!%p1060_p13), %s905_s28, 0 }
  0x2c   : > { %254 = sbr.rel (%p1060_p13) target bundleno = 743 (0x2e7), region = 48 }
  0x33   : > { %815 = dma.done.wait (%p1061_p1), [#allocation3], 512   ;;  %p1062_p0 = pmov %p1061_p1 }
  0x34   : > { %p285_p5 = scmp.lt.s32.totalorder %s905_s28, 2  ;;  %v841_v0 = vmov 0.0   ;;  %vm842_vm0 = vmmov 0   ;;  %v729_v1 = vld [vmem:[%s1046_s1] sm:$0xff]   ;;  %vm307_vm1 = vcmask 130048   ;;  %v731_v5 = vld [vmem:[%s1048_s3 + $0x8] sm:$0xff]  }
  0x35   : > { %817 = vsyncadd (%p1062_p0), [#allocation3], 4294966784  ;;  %645 = vmatprep.subr.bf16.mxu0 %v841_v0  ;;  %647 = vmatprep.mubr.msk.bf16.mxu0 %vm842_vm0, %v841_v0  ;;  %v730_v4 = vld [vmem:[%s1048_s3] sm:$0xff]   ;;  %v732_v6 = vld [vmem:[%s1048_s3 + $0x10] sm:$0xff]   ;;  %vm392_vm2 = vcmask 523264   ;;  %s282_s20 = sand.u32 1, %s828_s25  }
  0x36   : > { %s286_s16 = scalar_select %p285_p5, %s905_s28, 2  ;;  %651 = vmatprep.subr.bf16.mxu1 %v841_v0  ;;  %659 = vmatprep.mubr.msk.bf16.mxu1 %vm842_vm0, %v841_v0  ;;  %v733_v7 = vld [vmem:[%s1048_s3 + $0x18] sm:$0xff]   ;;  %v614_v8 = vld [vmem:[%s1047_s2] ss:$0 sm:$0xff]  ;;  %v735_v17 = vld [vmem:[#allocation2 + $0x8] sm:$0xff]  }
  0x37   : > { %646 = vmatpush3.bf16.msra.mxu0 %v729_v1  ;;  %652 = vmatpush3.bf16.msra.mxu1 %v730_v4  ;;  %v734_v16 = vld [vmem:[#allocation2] sm:$0xff]   ;;  %v736_v18 = vld [vmem:[#allocation2 + $0x10] sm:$0xff]   ;;  %v737_v19 = vld [vmem:[#allocation2 + $0x18] sm:$0xff]   ;;  %s612_s21 = sshll.u32 %s282_s20, 3  ;;  %s630_s29 = sshll.u32 %s905_s28, 7 }
  0x38   : > { %s613_s15 = sshll.u32 %s286_s16, 3  ;;  %663 = vmatprep.subr.bf16.mxu0 %v841_v0  ;;  %653 = vmatprep.subr.bf16.mxu1 %v841_v0  ;;  %v617_v20 = vld [vmem:[%s1049_s4] ss:$0 sm:$0xff]  ;;  %s284_s8 = scalar_lea.vmem [#allocation5], %s612_s21 }
  0x39   : > { %s288_s19 = scalar_lea.vmem %s1045_s0, %s613_s15  ;;  %v623_v28 = vld [vmem:[%s1051_s6] ss:$0 sm:$0xff]  ;;  %s535_s9 = sshll.u32 %s284_s8, 4  ;;  %s1005_s9 = int_to_ptr.vmem [resolvable:$true] %s535_s9 }
  0x3a   : > { %v290_v2 = vld [vmem:[%s288_s19] sm:$0xff]  ;;  %s1003_s16 = scalar_lea.hbm %s1052_s7, %s630_s29  ;;  %s522_s15 = scalar_lea.sflag [#allocation4], %s282_s20 }
  0x3b   : > { %v294_v3 = vpack.c.bf16 %v290_v2, %v290_v2  ;;  %654 = vmatpush3.bf16.msra.mxu1 %v731_v5  ;;  %s770_s28 = scalar_lea.vmem %s1005_s9, 128  ;;  %p1063_p9 = scmp.ne.s32.totalorder %s1056_s11, 0 }
  0x3c   : > { %655 = vmatprep.subr.bf16.mxu1 %v841_v0  ;;  %p771_p6 = scmp.ne.s32.totalorder %s1005_s9, %s770_s28  ;;  %s843_s18 = smov [#allocation5]  }
  0x3d   : > { %648 = vmatmul.mubr.msk.bf16.vlgmr.msra.gmra.mrb[0].mxu0 %vm307_vm1, %v294_v3  ;;  %s774_s13 = sshll.u32 %s843_s18, 4  ;;  %s775_s13 = int_to_ptr.vmem [resolvable:$false] %s774_s13 }
  0x3e   : > { %671 = vmatprep.mubr.msk.bf16.mxu0 %vm842_vm0, %v841_v0  ;;  %664 = vmatpush3.bf16.msra.mxu0 %v734_v16  ;;  %p772_p10 = pnand %p771_p6, %p1063_p9  ;;  %s776_s19 = scalar_lea.vmem %s775_s13, 256 }
  0x3f   : > { %656 = vmatpush3.bf16.msra.mxu1 %v732_v6  ;;  %665 = vmatprep.subr.bf16.mxu0 %v841_v0  ;;  %p777_p2 = scmp.lt.s32.totalorder %s1005_s9, %s775_s13  ;;  %p778_p3 = scmp.lt.s32.totalorder %s776_s19, %s770_s28 }
  0x40   : > { %657 = vmatprep.subr.bf16.mxu1 %v841_v0  ;;  %p773_p12 = pneg %p772_p10 }
  0x41   : > { %p779_p4 = por %p778_p3, %p777_p2 }
  0x42   : > { %666 = vmatpush3.bf16.msra.mxu0 %v735_v17 }
  0x43   : > { %658 = vmatpush3.bf16.msra.mxu1 %v733_v7  ;;  %667 = vmatprep.subr.bf16.mxu0 %v841_v0  ;;  %p780_p7 = pnand %p779_p4, %p773_p12 }
  0x46   : > { %668 = vmatpush3.bf16.msra.mxu0 %v736_v18 }
  0x47   : > { %669 = vmatprep.subr.bf16.mxu0 %v841_v0 }
  0x4a   : > { %670 = vmatpush3.bf16.msra.mxu0 %v737_v19 }
 0x110   : > { %v345_v9 = vpop.f32.mrb[0].mxu0 }
 0x111   : > { %v346_v10 = vadd.f32 %v614_v8, %v345_v9  ;;  %v649_v11 = vpop.f32.mrb[1].mxu0 }
 0x112   : > { %v348_v12 = vpop.f32.mrb[2].mxu0 }
 0x113   : > { %738 = vtanh.f32 %v346_v10  ;;  %v650_v13 = vpop.f32.mrb[3].mxu0 }
 0x11d   : > { %v739_v14 = vpop.eup %738 }
 0x11e   : > { %v361_v15 = vpack.c.bf16 %v739_v14, %v739_v14 }
 0x120   : > { %660 = vmatmul.mubr.msk.bf16.vlgmr.msra.gmra.mrb[0].mxu1 %vm392_vm2, %v361_v15 }
 0x1f3   : > { %v430_v21 = vpop.f32.mrb[0].mxu1 }
 0x1f4   : > { %v431_v22 = vadd.f32 %v617_v20, %v430_v21  ;;  %v661_v23 = vpop.f32.mrb[1].mxu1 }
 0x1f5   : > { %v433_v24 = vpop.f32.mrb[2].mxu1 }
 0x1f6   : > { %740 = vtanh.f32 %v431_v22  ;;  %v662_v25 = vpop.f32.mrb[3].mxu1 }
 0x200   : > { %v741_v26 = vpop.eup %740 }
 0x201   : > { %v446_v27 = vpack.c.bf16 %v741_v26, %v741_v26 }
 0x203   : > { %672 = vmatmul.mubr.msk.bf16.vlgmr.msra.gmra.mrb[4].mxu0 %vm392_vm2, %v446_v27 }
 0x2d6   : > { %v514_v29 = vpop.f32.mrb[4].mxu0 }
 0x2d7   : > { %v515_v30 = vadd.f32 %v623_v28, %v514_v29  ;;  %v673_v31 = vpop.f32.mrb[5].mxu0 }
 0x2d8   : > { %v517_v32 = vpop.f32.mrb[6].mxu0 }
 0x2d9   : > { %520 = vst [vmem:[%s284_s8] sm:$0xff] %v515_v30  ;;  %v674_v33 = vpop.f32.mrb[7].mxu0 }
 0x2da   : > { %783 = shalt.err (!%p780_p7)
}
 0x2db   : > { %s784_s20 = scalar_lea.hbm %s1003_s16, 128  ;;  %s788_s23 = scalar_lea.hbm %s1052_s7, 384 }
 0x2dc   : > { %p785_p8 = scmp.ne.s32.totalorder %s1003_s16, %s784_s20  ;;  %p789_p1 = scmp.lt.u32.totalorder %s1003_s16, %s1052_s7 }
 0x2dd   : > { %p790_p0 = scmp.lt.u32.totalorder %s788_s23, %s784_s20  ;;  %p792_p6 = scmp.lt.u32.totalorder %s784_s20, %s1003_s16 }
 0x2de   : > { %p786_p11 = pnand %p785_p8, %p1063_p9 }
 0x2df   : > { %p791_p5 = por %p790_p0, %p789_p1 }
 0x2e0   : > { %p787_p13 = pneg %p786_p11 }
 0x2e1   : > { %p793_p10 = por %p792_p6, %p791_p5 }
 0x2e3   : > { %p794_p12 = pnand %p793_p10, %p787_p13 }
 0x2e5   : > { %797 = shalt.err (!%p794_p12)
}
 0x2e6   : > { %679 = dma.vmem_to_hbm [thread:$0]  (%p1063_p9), %s1005_s9, 128, %s1003_s16, %s522_s15  }
 0x2e7 PF: > { %p691_p2 = scmp.ge.s32.totalorder %s836_s27, 2  ;;  %s547_s14 = sand.u32 1, %s824_s24  }
 0x2e8   : > { %p1064_p3 = scmp.ne.s32.totalorder %s1057_s12, 0  ;;  %s548_s17 = scalar_lea.sflag [#allocation4], %s547_s14 }
 0x2ea   : > { %p686_p4 = pnand %p691_p2, %p1064_p3 }
 0x2ec   : > { %819 = dma.done.wait (!%p686_p4), %s548_s17, 128  }
 0x2ed   : > { %821 = vsyncadd (!%p686_p4), %s548_s17, 4294967168  ;;  %p18_p7 = scmp.ge.s32.totalorder %s909_s30, 5   ;;  %s1065_s24 = smov %s828_s25 }
 0x2ee   : > { %s1066_s25 = smov %s832_s26  ;;  %s1067_s26 = smov %s920_s10 }
 0x2ef   : > { %s1068_s27 = smov %s909_s30  ;;  %20 = sbr.rel (!%p18_p7) target bundleno = 4 (0x4), region = 88 }
 0x2f6   :  { %553 = vsyncpa [#allocation3], 1 }
 0x2f7   :  { %555 = vsyncpa [#allocation3 + $0x1], 1 }
 0x2f8   :  { %556 = vsyncpa [#allocation4], 1 }
 0x2f9   :  { %558 = vsyncpa [#allocation4 + $0x1], 1 }

// kernel: tpu_custom_call.1
= control target key start
LH: loop header
LB: loop body
LE: loop exit
PB: predicated region body
PF: predicated region fallthrough
CT: control target
= control target key end

     0   :  { %12 = vsyncpa [#allocation3], 0  ;;  %s1045_s0 = inlined_call_operand.vmem [shape: f32[20,16], index: 0, kind: input, shape index: {}]   ;;  %s1046_s1 = inlined_call_operand.vmem [shape: bf16[16,64], index: 1, kind: input, shape index: {}]   ;;  %s1047_s2 = inlined_call_operand.vmem [shape: f32[1,64], index: 2, kind: input, shape index: {}]   ;;  %s1048_s3 = inlined_call_operand.vmem [shape: bf16[64,64], index: 3, kind: input, shape index: {}]   ;;  %s1049_s4 = inlined_call_operand.vmem [shape: f32[1,64], index: 4, kind: input, shape index: {}]   ;;  %s1050_s5 = inlined_call_operand.hbm [shape: bf16[64,128], index: 5, kind: input, shape index: {}]   ;;  %s1051_s6 = inlined_call_operand.vmem [shape: f32[1,128], index: 6, kind: input, shape index: {}]   ;;  %s1052_s7 = inlined_call_operand.hbm [shape: f32[20,128], index: 7, kind: output, shape index: {}]  }
   0x1   :  { %13 = vsyncpa [#allocation4], 0 }
   0x2   :  { %15 = vsyncpa [#allocation4 + $0x1], 0  ;;  %s884_s24 = smov 0   ;;  %s886_s25 = smov 0  }
   0x3   :  { %s888_s26 = smov 0   ;;  %s890_s27 = smov 0  }
   0x4 LB: > { %s905_s28 = sadd.s32 4294967295, %s836_s27   ;;  %s606_s29 = sadd.s32 4294967294, %s836_s27   ;;  %s836_s27 = sphi %s890_s27, %s1068_s27   ;;  %s832_s26 = sphi %s888_s26, %s1067_s26   ;;  %s828_s25 = sphi %s886_s25, %s1066_s25   ;;  %s824_s24 = sphi %s884_s24, %s1065_s24  }
   0x5   : > { %s909_s30 = sadd.s32 1, %s836_s27   ;;  %s180_s8 = sadd.s32 1, %s832_s26 }
   0x6   : > { %s177_s9 = ssub.s32 %s836_s27, %s909_s30  ;;  %p190_p0 = scmp.ne.s32.totalorder %s832_s26, %s828_s25 }
   0x7   : > { %p178_p1 = scmp.eq.s32.totalorder %s177_s9, 0  ;;  %p191_p2 = scmp.eq.s32.totalorder %s905_s28, 2 }
   0x8   : > { %p196_p3 = scmp.ne.s32.totalorder %s828_s25, %s824_s24  ;;  %p197_p4 = scmp.eq.s32.totalorder %s606_s29, 2 }
   0x9   : > { %s920_s10 = scalar_select %p178_p1, %s832_s26, %s180_s8  }
   0xa   : > { %p922_p5 = por %p191_p2, %p190_p0  ;;  %p926_p6 = por %p197_p4, %p196_p3 }
   0xb   : > { %p607_p7 = scmp.ge.s32.totalorder %s836_s27, 1  ;;  %p204_p8 = scmp.lt.s32.totalorder %s836_s27, 4 }
   0xc   : > { %s1056_s11 = scalar_select %p922_p5, 1, 0 }
   0xd   : > { %s1057_s12 = scalar_select %p926_p6, 1, 0 }
   0xe   : > { %p1053_p9 = scmp.eq.s32.totalorder %s905_s28, 0  ;;  %p933_p10 = pnand %p607_p7, %p204_p8 }
   0xf   : > { %s838_s14 = smov [#allocation2]   ;;  %s742_s19 = scalar_lea.hbm %s1050_s5, 512 }
  0x10   : > { %s1058_s13 = scalar_select %p933_p10, 1, 0 }
  0x11   : > { %s228_s15 = sshll.u32 %s838_s14, 4  ;;  %p681_p11 = pneg %p933_p10  ;;  %s229_s15 = int_to_ptr.vmem [resolvable:$true] %s228_s15 }
  0x12   : > { %p743_p13 = scmp.ne.s32.totalorder %s1050_s5, %s742_s19  ;;  %p749_p3 = scmp.lt.u32.totalorder %s742_s19, %s1050_s5 }
  0x13   : > { %p941_p12 = pnand %p1053_p9, %p681_p11 }
  0x15   : > { %p744_p0 = pneg %p941_p12 }
  0x17   : > { %p745_p1 = pnand %p744_p0, %p743_p13 }
  0x19   : > { %p746_p2 = pneg %p745_p1 }
  0x1b   : > { %p751_p4 = pnand %p749_p3, %p746_p2 }
  0x1d   : > { %754 = shalt.err (!%p751_p4)
}
  0x1e   : > { %s755_s29 = scalar_lea.vmem %s229_s15, 512  ;;  %p763_p9 = scmp.lt.s32.totalorder %s229_s15, %s229_s15 }
  0x1f   : > { %p756_p7 = scmp.ne.s32.totalorder %s229_s15, %s755_s29  ;;  %p764_p6 = scmp.lt.s32.totalorder %s755_s29, %s755_s29 }
  0x21   : > { %p758_p8 = pnand %p756_p7, %p744_p0  ;;  %p765_p5 = por %p764_p6, %p763_p9 }
  0x23   : > { %p759_p11 = pneg %p758_p8 }
  0x25   : > { %p766_p10 = pnand %p765_p5, %p759_p11 }
  0x27   : > { %769 = shalt.err (!%p766_p10)
}
  0x28   : > { %s839_s8 = smov 64   ;;  %s840_s9 = smov 4  }
  0x29   : > { %684 = dma.hbm_to_vmem [thread:$0]  (!%p941_p12), %s1050_s5, 512, %s229_s15, [#allocation3], %s839_s8, %s839_s8, %s840_s9  }
  0x2a   : > { %p1060_p13 = scmp.ne.s32.totalorder %s1058_s13, 0 }
  0x2b   : > { %p1061_p1 = scmp.eq.s32.totalorder (!%p1060_p13), %s905_s28, 0 }
  0x2c   : > { %254 = sbr.rel (%p1060_p13) target bundleno = 743 (0x2e7), region = 48 }
  0x33   : > { %815 = dma.done.wait (%p1061_p1), [#allocation3], 512   ;;  %p1062_p0 = pmov %p1061_p1 }
  0x34   : > { %p285_p5 = scmp.lt.s32.totalorder %s905_s28, 2  ;;  %v841_v0 = vmov 0.0   ;;  %vm842_vm0 = vmmov 0   ;;  %v729_v1 = vld [vmem:[%s1046_s1] sm:$0xff]   ;;  %vm307_vm1 = vcmask 130048   ;;  %v731_v5 = vld [vmem:[%s1048_s3 + $0x8] sm:$0xff]  }
  0x35   : > { %817 = vsyncadd (%p1062_p0), [#allocation3], 4294966784  ;;  %645 = vmatprep.subr.bf16.mxu0 %v841_v0  ;;  %647 = vmatprep.mubr.msk.bf16.mxu0 %vm842_vm0, %v841_v0  ;;  %v730_v4 = vld [vmem:[%s1048_s3] sm:$0xff]   ;;  %v732_v6 = vld [vmem:[%s1048_s3 + $0x10] sm:$0xff]   ;;  %vm392_vm2 = vcmask 523264   ;;  %s282_s20 = sand.u32 1, %s828_s25  }
  0x36   : > { %s286_s16 = scalar_select %p285_p5, %s905_s28, 2  ;;  %651 = vmatprep.subr.bf16.mxu1 %v841_v0  ;;  %659 = vmatprep.mubr.msk.bf16.mxu1 %vm842_vm0, %v841_v0  ;;  %v733_v7 = vld [vmem:[%s1048_s3 + $0x18] sm:$0xff]   ;;  %v614_v8 = vld [vmem:[%s1047_s2] ss:$0 sm:$0xff]  ;;  %v735_v17 = vld [vmem:[#allocation2 + $0x8] sm:$0xff]  }
  0x37   : > { %646 = vmatpush3.bf16.msra.mxu0 %v729_v1  ;;  %652 = vmatpush3.bf16.msra.mxu1 %v730_v4  ;;  %v734_v16 = vld [vmem:[#allocation2] sm:$0xff]   ;;  %v736_v18 = vld [vmem:[#allocation2 + $0x10] sm:$0xff]   ;;  %v737_v19 = vld [vmem:[#allocation2 + $0x18] sm:$0xff]   ;;  %s612_s21 = sshll.u32 %s282_s20, 3  ;;  %s630_s29 = sshll.u32 %s905_s28, 7 }
  0x38   : > { %s613_s15 = sshll.u32 %s286_s16, 3  ;;  %663 = vmatprep.subr.bf16.mxu0 %v841_v0  ;;  %653 = vmatprep.subr.bf16.mxu1 %v841_v0  ;;  %v617_v20 = vld [vmem:[%s1049_s4] ss:$0 sm:$0xff]  ;;  %s284_s8 = scalar_lea.vmem [#allocation5], %s612_s21 }
  0x39   : > { %s288_s19 = scalar_lea.vmem %s1045_s0, %s613_s15  ;;  %v623_v28 = vld [vmem:[%s1051_s6] ss:$0 sm:$0xff]  ;;  %s535_s9 = sshll.u32 %s284_s8, 4  ;;  %s1005_s9 = int_to_ptr.vmem [resolvable:$true] %s535_s9 }
  0x3a   : > { %v290_v2 = vld [vmem:[%s288_s19] sm:$0xff]  ;;  %s1003_s16 = scalar_lea.hbm %s1052_s7, %s630_s29  ;;  %s522_s15 = scalar_lea.sflag [#allocation4], %s282_s20 }
  0x3b   : > { %v294_v3 = vpack.c.bf16 %v290_v2, %v290_v2  ;;  %654 = vmatpush3.bf16.msra.mxu1 %v731_v5  ;;  %s770_s28 = scalar_lea.vmem %s1005_s9, 128  ;;  %p1063_p9 = scmp.ne.s32.totalorder %s1056_s11, 0 }
  0x3c   : > { %655 = vmatprep.subr.bf16.mxu1 %v841_v0  ;;  %p771_p6 = scmp.ne.s32.totalorder %s1005_s9, %s770_s28  ;;  %s843_s18 = smov [#allocation5]  }
  0x3d   : > { %648 = vmatmul.mubr.msk.bf16.vlgmr.msra.gmra.mrb[0].mxu0 %vm307_vm1, %v294_v3  ;;  %s774_s13 = sshll.u32 %s843_s18, 4  ;;  %s775_s13 = int_to_ptr.vmem [resolvable:$false] %s774_s13 }
  0x3e   : > { %671 = vmatprep.mubr.msk.bf16.mxu0 %vm842_vm0, %v841_v0  ;;  %664 = vmatpush3.bf16.msra.mxu0 %v734_v16  ;;  %p772_p10 = pnand %p771_p6, %p1063_p9  ;;  %s776_s19 = scalar_lea.vmem %s775_s13, 256 }
  0x3f   : > { %656 = vmatpush3.bf16.msra.mxu1 %v732_v6  ;;  %665 = vmatprep.subr.bf16.mxu0 %v841_v0  ;;  %p777_p2 = scmp.lt.s32.totalorder %s1005_s9, %s775_s13  ;;  %p778_p3 = scmp.lt.s32.totalorder %s776_s19, %s770_s28 }
  0x40   : > { %657 = vmatprep.subr.bf16.mxu1 %v841_v0  ;;  %p773_p12 = pneg %p772_p10 }
  0x41   : > { %p779_p4 = por %p778_p3, %p777_p2 }
  0x42   : > { %666 = vmatpush3.bf16.msra.mxu0 %v735_v17 }
  0x43   : > { %658 = vmatpush3.bf16.msra.mxu1 %v733_v7  ;;  %667 = vmatprep.subr.bf16.mxu0 %v841_v0  ;;  %p780_p7 = pnand %p779_p4, %p773_p12 }
  0x46   : > { %668 = vmatpush3.bf16.msra.mxu0 %v736_v18 }
  0x47   : > { %669 = vmatprep.subr.bf16.mxu0 %v841_v0 }
  0x4a   : > { %670 = vmatpush3.bf16.msra.mxu0 %v737_v19 }
 0x110   : > { %v345_v9 = vpop.f32.mrb[0].mxu0 }
 0x111   : > { %v346_v10 = vadd.f32 %v614_v8, %v345_v9  ;;  %v649_v11 = vpop.f32.mrb[1].mxu0 }
 0x112   : > { %v348_v12 = vpop.f32.mrb[2].mxu0 }
 0x113   : > { %738 = vtanh.f32 %v346_v10  ;;  %v650_v13 = vpop.f32.mrb[3].mxu0 }
 0x11d   : > { %v739_v14 = vpop.eup %738 }
 0x11e   : > { %v361_v15 = vpack.c.bf16 %v739_v14, %v739_v14 }
 0x120   : > { %660 = vmatmul.mubr.msk.bf16.vlgmr.msra.gmra.mrb[0].mxu1 %vm392_vm2, %v361_v15 }
 0x1f3   : > { %v430_v21 = vpop.f32.mrb[0].mxu1 }
 0x1f4   : > { %v431_v22 = vadd.f32 %v617_v20, %v430_v21  ;;  %v661_v23 = vpop.f32.mrb[1].mxu1 }
 0x1f5   : > { %v433_v24 = vpop.f32.mrb[2].mxu1 }
 0x1f6   : > { %740 = vtanh.f32 %v431_v22  ;;  %v662_v25 = vpop.f32.mrb[3].mxu1 }
 0x200   : > { %v741_v26 = vpop.eup %740 }
 0x201   : > { %v446_v27 = vpack.c.bf16 %v741_v26, %v741_v26 }
 0x203   : > { %672 = vmatmul.mubr.msk.bf16.vlgmr.msra.gmra.mrb[4].mxu0 %vm392_vm2, %v446_v27 }
 0x2d6   : > { %v514_v29 = vpop.f32.mrb[4].mxu0 }
 0x2d7   : > { %v515_v30 = vadd.f32 %v623_v28, %v514_v29  ;;  %v673_v31 = vpop.f32.mrb[5].mxu0 }
 0x2d8   : > { %v517_v32 = vpop.f32.mrb[6].mxu0 }
 0x2d9   : > { %520 = vst [vmem:[%s284_s8] sm:$0xff] %v515_v30  ;;  %v674_v33 = vpop.f32.mrb[7].mxu0 }
 0x2da   : > { %783 = shalt.err (!%p780_p7)
}
 0x2db   : > { %s784_s20 = scalar_lea.hbm %s1003_s16, 128  ;;  %s788_s23 = scalar_lea.hbm %s1052_s7, 384 }
 0x2dc   : > { %p785_p8 = scmp.ne.s32.totalorder %s1003_s16, %s784_s20  ;;  %p789_p1 = scmp.lt.u32.totalorder %s1003_s16, %s1052_s7 }
 0x2dd   : > { %p790_p0 = scmp.lt.u32.totalorder %s788_s23, %s784_s20  ;;  %p792_p6 = scmp.lt.u32.totalorder %s784_s20, %s1003_s16 }
 0x2de   : > { %p786_p11 = pnand %p785_p8, %p1063_p9 }
 0x2df   : > { %p791_p5 = por %p790_p0, %p789_p1 }
 0x2e0   : > { %p787_p13 = pneg %p786_p11 }
 0x2e1   : > { %p793_p10 = por %p792_p6, %p791_p5 }
 0x2e3   : > { %p794_p12 = pnand %p793_p10, %p787_p13 }
 0x2e5   : > { %797 = shalt.err (!%p794_p12)
}
 0x2e6   : > { %679 = dma.vmem_to_hbm [thread:$0]  (%p1063_p9), %s1005_s9, 128, %s1003_s16, %s522_s15  }
 0x2e7 PF: > { %p691_p2 = scmp.ge.s32.totalorder %s836_s27, 2  ;;  %s547_s14 = sand.u32 1, %s824_s24  }
 0x2e8   : > { %p1064_p3 = scmp.ne.s32.totalorder %s1057_s12, 0  ;;  %s548_s17 = scalar_lea.sflag [#allocation4], %s547_s14 }
 0x2ea   : > { %p686_p4 = pnand %p691_p2, %p1064_p3 }
 0x2ec   : > { %819 = dma.done.wait (!%p686_p4), %s548_s17, 128  }
 0x2ed   : > { %821 = vsyncadd (!%p686_p4), %s548_s17, 4294967168  ;;  %p18_p7 = scmp.ge.s32.totalorder %s909_s30, 5   ;;  %s1065_s24 = smov %s828_s25 }
 0x2ee   : > { %s1066_s25 = smov %s832_s26  ;;  %s1067_s26 = smov %s920_s10 }
 0x2ef   : > { %s1068_s27 = smov %s909_s30  ;;  %20 = sbr.rel (!%p18_p7) target bundleno = 4 (0x4), region = 88 }
 0x2f6   :  { %553 = vsyncpa [#allocation3], 1 }
 0x2f7   :  { %555 = vsyncpa [#allocation3 + $0x1], 1 }
 0x2f8   :  { %556 = vsyncpa [#allocation4], 1 }
 0x2f9   :  { %558 = vsyncpa [#allocation4 + $0x1], 1 }

</bundles_post_ra>
